<compile_context>
chip_gen: v6e
topology: v6e:2x2x1
jax: 0.10.0
libtpu: 0.0.40
codegen_flags: <defaults>
</compile_context>

<pallas_src>
import jax
import jax.numpy as jnp
from jax.experimental import pallas as pl
from jax.experimental.pallas import tpu as pltpu

_LANE = 128   # lane tile (last dim)
_SUB = 8      # sublane tile


def _make_dice_kernel(block_rows, tail_valid_rows, num_blocks, blocks_per_split):
    """Bakes static metadata (all sizes known at trace time) into the kernel."""

    def _partial(a):
        # (br, 128) -> (br/8, 8, 128) regroups whole (8,128) sublane tiles, so the
        # sum over axis 0 is a tree of plain vreg adds (no cross-lane work).
        return a.reshape(-1, _SUB, _LANE).sum(axis=0)

    def kernel(x_ref, t_ref, out_ref):
        s = pl.program_id(0)       # core split (parallel)
        i = pl.program_id(1)       # row-block within the split (reduction)

        # The small (2, 8, 128) output block stays resident across the reduction
        # axis; init once per split.
        @pl.when(i == 0)
        def _init():
            out_ref[...] = jnp.zeros_like(out_ref)

        # Upcast after the VMEM load (inputs may arrive as bf16 / int8 in HBM).
        x = x_ref[...].astype(jnp.float32)
        t = t_ref[...].astype(jnp.float32)

        # sigmoid via a single EUP transcendental (tanh) instead of exp+divide.
        p = 0.5 * (jnp.tanh(0.5 * x) + 1.0)

        pt = p * t          # -> intersection partial
        ps = p + t          # -> sigmoid(x).sum() + targets.sum() partial

        gblock = s * blocks_per_split + i   # global block index along the rows

        # Interior (fully valid) blocks: plain partial-sum accumulation.
        @pl.when(gblock < num_blocks - 1)
        def _body():
            out_ref[0] += _partial(pt)
            out_ref[1] += _partial(ps)

        # Globally-last block: mask out rows past the valid extent (covers the
        # OOB rows of a partial last block; jnp.where discards any garbage, so
        # NaN/Inf cannot leak into the sums).
        @pl.when(gblock == num_blocks - 1)
        def _tail():
            if tail_valid_rows == block_rows:      # static: nothing to mask
                out_ref[0] += _partial(pt)
                out_ref[1] += _partial(ps)
            else:
                rid = jax.lax.broadcasted_iota(jnp.int32, (block_rows, _LANE), 0)
                valid = rid < tail_valid_rows
                out_ref[0] += _partial(jnp.where(valid, pt, 0.0))
                out_ref[1] += _partial(jnp.where(valid, ps, 0.0))

        # gblock > num_blocks - 1 only happens for the padded iteration of an
        # uneven two-core split; its contribution is (correctly) skipped.

    return kernel


def dice_loss1(inputs, targets, smooth=1.0, block_rows=2048):
    """Pallas implementation of DiceLoss1.forward (returns a scalar loss)."""
    x = inputs.reshape(-1)
    t = targets.reshape(-1)
    # Keep narrow dtypes in HBM; bool is the one dtype we normalize (i1 loads
    # are awkward) — int8 keeps targets at 1 byte/elem.
    if x.dtype == jnp.bool_:
        x = x.astype(jnp.float32)
    if t.dtype == jnp.bool_:
        t = t.astype(jnp.int8)

    n = x.shape[0]
    rows = n // _LANE
    n_main = rows * _LANE

    # <128-element remainder: fold it in with a tiny jnp expression instead of
    # materializing a padded copy of the whole stream.
    inter = jnp.float32(0.0)
    denom = jnp.float32(0.0)
    if n_main != n:
        xt = x[n_main:].astype(jnp.float32)
        tt = t[n_main:].astype(jnp.float32)
        pt_tail = jax.nn.sigmoid(xt)
        inter = inter + jnp.sum(pt_tail * tt)
        denom = denom + jnp.sum(pt_tail) + jnp.sum(tt)

    if rows < _SUB:
        # Tiny input (< 1024 elements): not worth a kernel launch — pure jnp.
        if rows > 0:
            xm = x[:n_main].astype(jnp.float32)
            tm = t[:n_main].astype(jnp.float32)
            pm = jax.nn.sigmoid(xm)
            inter = inter + jnp.sum(pm * tm)
            denom = denom + jnp.sum(pm) + jnp.sum(tm)
        dice = (2.0 * inter + smooth) / (denom + smooth)
        return (1.0 - dice).astype(jnp.float32)

    # Copy-free lane-major view of the prefix (free bitcast when n % 128 == 0,
    # the typical conv-feature-map case).
    if n_main != n:
        x2 = x[:n_main].reshape(rows, _LANE)
        t2 = t[:n_main].reshape(rows, _LANE)
    else:
        x2 = x.reshape(rows, _LANE)
        t2 = t.reshape(rows, _LANE)

    # Effective block rows: a multiple of 8, never larger than the row count.
    br = min(max(_SUB, (block_rows // _SUB) * _SUB), (rows // _SUB) * _SUB)
    num_blocks = pl.cdiv(rows, br)             # last block may be partial -> masked
    tail_valid_rows = rows - (num_blocks - 1) * br

    # Split the row stream across 2 TensorCores (v7x megacore); on 1-TC chips the
    # outer axis is just a cheap serial loop.
    splits = 2 if num_blocks >= 2 else 1
    blocks_per_split = pl.cdiv(num_blocks, splits)

    def in_map(s, i):
        # Clamp so the padded iteration of an uneven split stays in bounds; the
        # kernel skips its contribution (the repeated block index elides the DMA).
        return (jnp.minimum(s * blocks_per_split + i, num_blocks - 1), 0)

    kernel = _make_dice_kernel(br, tail_valid_rows, num_blocks, blocks_per_split)

    partials = pl.pallas_call(
        kernel,
        out_shape=jax.ShapeDtypeStruct((splits, 2, _SUB, _LANE), jnp.float32),
        grid=(splits, blocks_per_split),
        in_specs=[
            pl.BlockSpec((br, _LANE), in_map),
            pl.BlockSpec((br, _LANE), in_map),
        ],
        # Tiny lane-dense accumulator block, resident across the reduction axis;
        # written back to HBM only once per split (8 KiB).
        out_specs=pl.BlockSpec((None, 2, _SUB, _LANE), lambda s, i: (s, 0, 0, 0)),
        compiler_params=pltpu.CompilerParams(
            dimension_semantics=("parallel", "arbitrary"),
            vmem_limit_bytes=32 * 1024 * 1024),
    )(x2, t2)

    # Tiny final reduction (splits*2*8*128 floats) + dice formula in the wrapper.
    intersection = inter + partials[:, 0].sum()
    denominator = denom + partials[:, 1].sum()     # = sum(sigmoid(x)) + sum(t)
    dice = (2.0 * intersection + smooth) / (denominator + smooth)
    return (1.0 - dice).astype(jnp.float32)


def _dice_loss_ref(inputs, targets, smooth=1.0):
    p = jax.nn.sigmoid(inputs.reshape(-1).astype(jnp.float32))
    t = targets.reshape(-1).astype(jnp.float32)
    inter = jnp.sum(p * t)
    dice = (2.0 * inter + smooth) / (jnp.sum(p) + jnp.sum(t) + smooth)
    return 1.0 - dice


if __name__ == "__main__":
    key = jax.random.PRNGKey(0)
    k1, k2, k3, k4 = jax.random.split(key, 4)

    # NCHW conv-style logits and binary targets, as the PyTorch module expects.
    inputs = jax.random.normal(k1, (2, 4, 16, 16), dtype=jnp.float32)
    targets = jax.random.bernoulli(k2, p=0.3, shape=(2, 4, 16, 16)).astype(jnp.float32)

    loss = jax.block_until_ready(dice_loss1(inputs, targets, smooth=1.0))
    ref = jax.block_until_ready(_dice_loss_ref(inputs, targets, smooth=1.0))
    assert jnp.allclose(loss, ref, atol=1e-4, rtol=1e-4), (loss, ref)

    # numel % 128 != 0: wrapper tail path + partial last block row-mask + 2 splits.
    x2 = jax.random.normal(k3, (3, 5, 7, 11), dtype=jnp.float32)
    t2 = jax.random.bernoulli(k4, p=0.5, shape=(3, 5, 7, 11)).astype(jnp.float32)
    loss2 = jax.block_until_ready(dice_loss1(x2, t2, smooth=1.0))
    ref2 = jax.block_until_ready(_dice_loss_ref(x2, t2, smooth=1.0))
    assert jnp.allclose(loss2, ref2, atol=1e-4, rtol=1e-4), (loss2, ref2)

    # Multi-block + even two-way core split (small block_rows forces 2 blocks).
    loss3 = jax.block_until_ready(dice_loss1(inputs, targets, smooth=1.0, block_rows=8))
    assert jnp.allclose(loss3, ref, atol=1e-4, rtol=1e-4), (loss3, ref)

    # Odd number of blocks -> uneven split (padded iteration skipped in-kernel).
    x4 = jax.random.normal(k3, (3, 4, 16, 16), dtype=jnp.float32)
    t4 = jax.random.bernoulli(k4, p=0.4, shape=(3, 4, 16, 16)).astype(jnp.float32)
    loss4 = jax.block_until_ready(dice_loss1(x4, t4, smooth=1.0, block_rows=8))
    ref4 = jax.block_until_ready(_dice_loss_ref(x4, t4, smooth=1.0))
    assert jnp.allclose(loss4, ref4, atol=1e-4, rtol=1e-4), (loss4, ref4)

    # Narrow-dtype inputs stay narrow in HBM; upcast happens inside the kernel.
    loss5 = jax.block_until_ready(dice_loss1(inputs.astype(jnp.bfloat16), targets))
    ref5 = jax.block_until_ready(_dice_loss_ref(inputs.astype(jnp.bfloat16), targets))
    assert jnp.allclose(loss5, ref5, atol=1e-3, rtol=1e-3), (loss5, ref5)

    # Tiny input (< 1024 elements): pure-jnp fallback path.
    x6 = jax.random.normal(k1, (2, 20), dtype=jnp.float32)
    t6 = jax.random.bernoulli(k2, p=0.5, shape=(2, 20)).astype(jnp.float32)
    loss6 = jax.block_until_ready(dice_loss1(x6, t6, smooth=1.0))
    ref6 = jax.block_until_ready(_dice_loss_ref(x6, t6, smooth=1.0))
    assert jnp.allclose(loss6, ref6, atol=1e-4, rtol=1e-4), (loss6, ref6)

    print("KERNEL_OK")
</pallas_src>

<mosaic_0001>
module attributes {stable_mosaic.version = 11 : i64} {
  func.func @kernel(%arg0: i32, %arg1: i32, %arg2: memref<16x128xf32, #tpu.memory_space<vmem>>, %arg3: memref<16x128xf32, #tpu.memory_space<vmem>>, %arg4: memref<1x2x8x128xf32, #tpu.memory_space<vmem>>) attributes {dimension_semantics = [#tpu.dimension_semantics<parallel>, #tpu.dimension_semantics<arbitrary>], iteration_bounds = array<i64: 1, 1>, scalar_prefetch = 0 : i64, scratch_operands = 0 : i64, tpu.core_type = #tpu.core_type<tc>, window_params = [{transform_indices = @transform_0, window_bounds = array<i64: 16, 128>}, {transform_indices = @transform_1, window_bounds = array<i64: 16, 128>}, {transform_indices = @transform_2, window_bounds = array<i64: 1, 2, 8, 128>}]} {
    %c0_i32 = arith.constant 0 : i32
    %0 = arith.cmpi eq, %arg1, %c0_i32 : i32
    %1 = arith.extui %0 : i1 to i32
    %c0_i32_0 = arith.constant 0 : i32
    %2 = arith.cmpi ne, %1, %c0_i32_0 : i32
    scf.if %2 {
      %cst_10 = arith.constant 0.000000e+00 : f32
      %22 = vector.broadcast %cst_10 : f32 to vector<2x8x128xf32>
      %c0_11 = arith.constant 0 : index
      %c0_12 = arith.constant 0 : index
      %c0_13 = arith.constant 0 : index
      %c0_14 = arith.constant 0 : index
      %23 = vector.load %arg4[%c0_11, %c0_12, %c0_13, %c0_14] : memref<1x2x8x128xf32, #tpu.memory_space<vmem>>, vector<1x2x8x128xf32>
      %24 = vector.shape_cast %23 : vector<1x2x8x128xf32> to vector<2x8x128xf32>
      %25 = vector.shape_cast %22 : vector<2x8x128xf32> to vector<1x2x8x128xf32>
      tpu.vector_store %arg4[%c0_11, %c0_12, %c0_13, %c0_14], %25 {strides = array<i32>} : memref<1x2x8x128xf32, #tpu.memory_space<vmem>>, vector<1x2x8x128xf32>,
    } else {
    }
    %c0 = arith.constant 0 : index
    %c0_1 = arith.constant 0 : index
    %3 = vector.load %arg2[%c0, %c0_1] : memref<16x128xf32, #tpu.memory_space<vmem>>, vector<16x128xf32>
    %c0_2 = arith.constant 0 : index
    %c0_3 = arith.constant 0 : index
    %4 = vector.load %arg3[%c0_2, %c0_3] : memref<16x128xf32, #tpu.memory_space<vmem>>, vector<16x128xf32>
    %cst = arith.constant 5.000000e-01 : f32
    %5 = vector.broadcast %cst : f32 to vector<16x128xf32>
    %6 = arith.mulf %5, %3 : vector<16x128xf32>
    %7 = math.tanh %6 : vector<16x128xf32>
    %cst_4 = arith.constant 1.000000e+00 : f32
    %8 = vector.broadcast %cst_4 : f32 to vector<16x128xf32>
    %9 = arith.addf %7, %8 : vector<16x128xf32>
    %cst_5 = arith.constant 5.000000e-01 : f32
    %10 = vector.broadcast %cst_5 : f32 to vector<16x128xf32>
    %11 = arith.mulf %10, %9 : vector<16x128xf32>
    %12 = arith.mulf %11, %4 : vector<16x128xf32>
    %13 = arith.addf %11, %4 : vector<16x128xf32>
    %c1_i32 = arith.constant 1 : i32
    %14 = arith.muli %arg0, %c1_i32 : i32
    %15 = arith.addi %14, %arg1 : i32
    %c0_i32_6 = arith.constant 0 : i32
    %16 = arith.cmpi slt, %15, %c0_i32_6 : i32
    %17 = arith.extui %16 : i1 to i32
    %c0_i32_7 = arith.constant 0 : i32
    %18 = arith.cmpi ne, %17, %c0_i32_7 : i32
    scf.if %18 {
      %c0_10 = arith.constant 0 : index
      %c0_11 = arith.constant 0 : index
      %c0_12 = arith.constant 0 : index
      %c0_13 = arith.constant 0 : index
      %22 = vector.load %arg4[%c0_10, %c0_11, %c0_12, %c0_13] : memref<1x2x8x128xf32, #tpu.memory_space<vmem>>, vector<1x1x8x128xf32>
      %23 = vector.shape_cast %22 : vector<1x1x8x128xf32> to vector<8x128xf32>
      %24 = vector.shape_cast %12 : vector<16x128xf32> to vector<2x8x128xf32>
      %cst_14 = arith.constant dense<0.000000e+00> : vector<8x128xf32>
      %25 = vector.multi_reduction <add>, %24, %cst_14 [0] : vector<2x8x128xf32> to vector<8x128xf32>
      %26 = arith.addf %23, %25 : vector<8x128xf32>
      %c0_15 = arith.constant 0 : index
      %c0_16 = arith.constant 0 : index
      %c0_17 = arith.constant 0 : index
      %c0_18 = arith.constant 0 : index
      %27 = vector.load %arg4[%c0_15, %c0_16, %c0_17, %c0_18] : memref<1x2x8x128xf32, #tpu.memory_space<vmem>>, vector<1x1x8x128xf32>
      %28 = vector.shape_cast %27 : vector<1x1x8x128xf32> to vector<8x128xf32>
      %29 = vector.shape_cast %26 : vector<8x128xf32> to vector<1x1x8x128xf32>
      tpu.vector_store %arg4[%c0_15, %c0_16, %c0_17, %c0_18], %29 {strides = array<i32>} : memref<1x2x8x128xf32, #tpu.memory_space<vmem>>, vector<1x1x8x128xf32>,
      %c0_19 = arith.constant 0 : index
      %c1 = arith.constant 1 : index
      %c0_20 = arith.constant 0 : index
      %c0_21 = arith.constant 0 : index
      %30 = vector.load %arg4[%c0_19, %c1, %c0_20, %c0_21] : memref<1x2x8x128xf32, #tpu.memory_space<vmem>>, vector<1x1x8x128xf32>
      %31 = vector.shape_cast %30 : vector<1x1x8x128xf32> to vector<8x128xf32>
      %32 = vector.shape_cast %13 : vector<16x128xf32> to vector<2x8x128xf32>
      %cst_22 = arith.constant dense<0.000000e+00> : vector<8x128xf32>
      %33 = vector.multi_reduction <add>, %32, %cst_22 [0] : vector<2x8x128xf32> to vector<8x128xf32>
      %34 = arith.addf %31, %33 : vector<8x128xf32>
      %c0_23 = arith.constant 0 : index
      %c1_24 = arith.constant 1 : index
      %c0_25 = arith.constant 0 : index
      %c0_26 = arith.constant 0 : index
      %35 = vector.load %arg4[%c0_23, %c1_24, %c0_25, %c0_26] : memref<1x2x8x128xf32, #tpu.memory_space<vmem>>, vector<1x1x8x128xf32>
      %36 = vector.shape_cast %35 : vector<1x1x8x128xf32> to vector<8x128xf32>
      %37 = vector.shape_cast %34 : vector<8x128xf32> to vector<1x1x8x128xf32>
      tpu.vector_store %arg4[%c0_23, %c1_24, %c0_25, %c0_26], %37 {strides = array<i32>} : memref<1x2x8x128xf32, #tpu.memory_space<vmem>>, vector<1x1x8x128xf32>,
    } else {
    }
    %c0_i32_8 = arith.constant 0 : i32
    %19 = arith.cmpi eq, %15, %c0_i32_8 : i32
    %20 = arith.extui %19 : i1 to i32
    %c0_i32_9 = arith.constant 0 : i32
    %21 = arith.cmpi ne, %20, %c0_i32_9 : i32
    scf.if %21 {
      %c0_10 = arith.constant 0 : index
      %c0_11 = arith.constant 0 : index
      %c0_12 = arith.constant 0 : index
      %c0_13 = arith.constant 0 : index
      %22 = vector.load %arg4[%c0_10, %c0_11, %c0_12, %c0_13] : memref<1x2x8x128xf32, #tpu.memory_space<vmem>>, vector<1x1x8x128xf32>
      %23 = vector.shape_cast %22 : vector<1x1x8x128xf32> to vector<8x128xf32>
      %24 = vector.shape_cast %12 : vector<16x128xf32> to vector<2x8x128xf32>
      %cst_14 = arith.constant dense<0.000000e+00> : vector<8x128xf32>
      %25 = vector.multi_reduction <add>, %24, %cst_14 [0] : vector<2x8x128xf32> to vector<8x128xf32>
      %26 = arith.addf %23, %25 : vector<8x128xf32>
      %c0_15 = arith.constant 0 : index
      %c0_16 = arith.constant 0 : index
      %c0_17 = arith.constant 0 : index
      %c0_18 = arith.constant 0 : index
      %27 = vector.load %arg4[%c0_15, %c0_16, %c0_17, %c0_18] : memref<1x2x8x128xf32, #tpu.memory_space<vmem>>, vector<1x1x8x128xf32>
      %28 = vector.shape_cast %27 : vector<1x1x8x128xf32> to vector<8x128xf32>
      %29 = vector.shape_cast %26 : vector<8x128xf32> to vector<1x1x8x128xf32>
      tpu.vector_store %arg4[%c0_15, %c0_16, %c0_17, %c0_18], %29 {strides = array<i32>} : memref<1x2x8x128xf32, #tpu.memory_space<vmem>>, vector<1x1x8x128xf32>,
      %c0_19 = arith.constant 0 : index
      %c1 = arith.constant 1 : index
      %c0_20 = arith.constant 0 : index
      %c0_21 = arith.constant 0 : index
      %30 = vector.load %arg4[%c0_19, %c1, %c0_20, %c0_21] : memref<1x2x8x128xf32, #tpu.memory_space<vmem>>, vector<1x1x8x128xf32>
      %31 = vector.shape_cast %30 : vector<1x1x8x128xf32> to vector<8x128xf32>
      %32 = vector.shape_cast %13 : vector<16x128xf32> to vector<2x8x128xf32>
      %cst_22 = arith.constant dense<0.000000e+00> : vector<8x128xf32>
      %33 = vector.multi_reduction <add>, %32, %cst_22 [0] : vector<2x8x128xf32> to vector<8x128xf32>
      %34 = arith.addf %31, %33 : vector<8x128xf32>
      %c0_23 = arith.constant 0 : index
      %c1_24 = arith.constant 1 : index
      %c0_25 = arith.constant 0 : index
      %c0_26 = arith.constant 0 : index
      %35 = vector.load %arg4[%c0_23, %c1_24, %c0_25, %c0_26] : memref<1x2x8x128xf32, #tpu.memory_space<vmem>>, vector<1x1x8x128xf32>
      %36 = vector.shape_cast %35 : vector<1x1x8x128xf32> to vector<8x128xf32>
      %37 = vector.shape_cast %34 : vector<8x128xf32> to vector<1x1x8x128xf32>
      tpu.vector_store %arg4[%c0_23, %c1_24, %c0_25, %c0_26], %37 {strides = array<i32>} : memref<1x2x8x128xf32, #tpu.memory_space<vmem>>, vector<1x1x8x128xf32>,
    } else {
    }
    return
  }
  func.func @transform_0(%arg0: i32, %arg1: i32) -> (i32, i32) {
    %c1_i32 = arith.constant 1 : i32
    %0 = arith.muli %arg0, %c1_i32 : i32
    %1 = arith.addi %0, %arg1 : i32
    %c0_i32 = arith.constant 0 : i32
    %2 = arith.minsi %1, %c0_i32 : i32
    %c0_i32_0 = arith.constant 0 : i32
    %c0_i32_1 = arith.constant 0 : i32
    return %2, %c0_i32_0 : i32, i32
  }
  func.func @transform_1(%arg0: i32, %arg1: i32) -> (i32, i32) {
    %c1_i32 = arith.constant 1 : i32
    %0 = arith.muli %arg0, %c1_i32 : i32
    %1 = arith.addi %0, %arg1 : i32
    %c0_i32 = arith.constant 0 : i32
    %2 = arith.minsi %1, %c0_i32 : i32
    %c0_i32_0 = arith.constant 0 : i32
    %c0_i32_1 = arith.constant 0 : i32
    return %2, %c0_i32_0 : i32, i32
  }
  func.func @transform_2(%arg0: i32, %arg1: i32) -> (i32, i32, i32, i32) {
    %c0_i32 = arith.constant 0 : i32
    %c0_i32_0 = arith.constant 0 : i32
    %c0_i32_1 = arith.constant 0 : i32
    %c0_i32_2 = arith.constant 0 : i32
    return %arg0, %c0_i32, %c0_i32_0, %c0_i32_1 : i32, i32, i32, i32
  }
}

</mosaic_0001>

<bundles_post_ra>
// kernel: tpu_custom_call.1
= control target key start
LH: loop header
LB: loop body
LE: loop exit
PB: predicated region body
PF: predicated region fallthrough
CT: control target
= control target key end

     0   :  { %7 = vsyncpa [#allocation3], 0  ;;  %s245_s0 = inlined_call_operand.hbm [shape: f32[16,128], index: 0, kind: input, shape index: {}]   ;;  %s246_s1 = inlined_call_operand.hbm [shape: f32[16,128], index: 1, kind: input, shape index: {}]   ;;  %s247_s2 = inlined_call_operand.hbm [shape: f32[1,2,8,128], index: 2, kind: output, shape index: {}]  }
   0x1   :  { %8 = vsyncpa [#allocation6], 0 }
   0x2   :  { %9 = vsyncpa [#allocation4], 0  ;;  %s207_s9 = smov [#allocation2]  }
   0x3   :  { %s21_s10 = sshll.u32 %s207_s9, 4  ;;  %s22_s10 = int_to_ptr.vmem [resolvable:$true] %s21_s10 }
   0x4   :  { %s149_s11 = scalar_lea.vmem %s22_s10, 256  ;;  %p154_p1 = scmp.lt.s32.totalorder %s22_s10, %s22_s10 }
   0x5   :  { %p150_p0 = scmp.ne.s32.totalorder %s22_s10, %s149_s11  ;;  %p155_p2 = scmp.lt.s32.totalorder %s149_s11, %s149_s11 }
   0x7   :  { %p156_p3 = por %p155_p2, %p154_p1 }
   0x9   :  { %p157_p4 = pnand %p156_p3, %p150_p0 }
   0xb   :  { %160 = shalt.err (!%p157_p4)
}
   0xc   :  { %s208_s12 = smov 128   ;;  %s209_s13 = smov 8  }
   0xd   :  { %27 = dma.hbm_to_vmem [thread:$0]  %s245_s0, 256, %s22_s10, [#allocation3], %s208_s12, %s208_s12, %s209_s13  }
   0xe   :  { %s210_s16 = smov [#allocation5]  }
   0xf   :  { %s39_s17 = sshll.u32 %s210_s16, 4  ;;  %s40_s17 = int_to_ptr.vmem [resolvable:$true] %s39_s17 }
  0x10   :  { %s169_s18 = scalar_lea.vmem %s40_s17, 256  ;;  %p174_p6 = scmp.lt.s32.totalorder %s40_s17, %s40_s17 }
  0x11   :  { %p170_p5 = scmp.ne.s32.totalorder %s40_s17, %s169_s18  ;;  %p175_p7 = scmp.lt.s32.totalorder %s169_s18, %s169_s18 }
  0x13   :  { %p176_p8 = por %p175_p7, %p174_p6 }
  0x15   :  { %p177_p9 = pnand %p176_p8, %p170_p5 }
  0x17   :  { %180 = shalt.err (!%p177_p9)
}
  0x18   :  { %45 = dma.hbm_to_vmem [thread:$0]  %s246_s1, 256, %s40_s17, [#allocation6], %s208_s12, %s208_s12, %s209_s13  }
  0x19   :  { %201 = dma.done.wait [#allocation3], 256  }
  0x1a   :  { %202 = vsyncadd [#allocation3], 4294967040 }
  0x1b   :  { %203 = dma.done.wait [#allocation6], 256  }
  0x1c   :  { %204 = vsyncadd [#allocation6], 4294967040  ;;  %v66_v0 = vld [vmem:[#allocation2] sm:$0xff]  ;;  %v67_v1 = vld [vmem:[#allocation2 + $0x8] sm:$0xff]  ;;  %s211_s0 = smov [#allocation7]  }
  0x1d   :  { %v70_v2 = vmul.f32 0.5, %v66_v0  ;;  %v71_v3 = vmul.f32 0.5, %v67_v1  ;;  %v68_v7 = vld [vmem:[#allocation5] sm:$0xff]  ;;  %v69_v9 = vld [vmem:[#allocation5 + $0x8] sm:$0xff]  ;;  %s114_s1 = sshll.u32 %s211_s0, 4  ;;  %s115_s1 = int_to_ptr.vmem [resolvable:$true] %s114_s1 }
  0x1e   :  { %s181_s21 = scalar_lea.vmem %s115_s1, 256  ;;  %p186_p11 = scmp.lt.s32.totalorder %s115_s1, %s115_s1 }
  0x1f   :  { %137 = vtanh.f32 %v70_v2  ;;  %p182_p10 = scmp.ne.s32.totalorder %s115_s1, %s181_s21  ;;  %p187_p12 = scmp.lt.s32.totalorder %s181_s21, %s181_s21 }
  0x20   :  { %139 = vtanh.f32 %v71_v3 }
  0x21   :  { %p188_p13 = por %p187_p12, %p186_p11 }
  0x23   :  { %p189_p0 = pnand %p188_p13, %p182_p10 }
  0x2c   :  { %v138_v4 = vpop.eup %137 }
  0x2d   :  { %v140_v5 = vpop.eup %139  ;;  %v74_v6 = vadd.f32 1.0, %v138_v4 }
  0x2e   :  { %v75_v8 = vadd.f32 1.0, %v140_v5 }
  0x2f   :  { %v76_v10 = vmul.f32 0.5, %v74_v6 }
  0x30   :  { %v77_v11 = vmul.f32 0.5, %v75_v8 }
  0x31   :  { %v78_v12 = vmul.f32 %v76_v10, %v68_v7  ;;  %v80_v13 = vadd.f32 %v76_v10, %v68_v7 }
  0x32   :  { %v79_v14 = vmul.f32 %v77_v11, %v69_v9  ;;  %v81_v15 = vadd.f32 %v77_v11, %v69_v9 }
  0x34   :  { %v101_v16 = vadd.f32 %v79_v14, %v78_v12  ;;  %v106_v17 = vadd.f32 %v81_v15, %v80_v13 }
  0x36   :  { %103 = vst [vmem:[#allocation7] sm:$0xff] %v101_v16  ;;  %108 = vst [vmem:[#allocation7 + $0x8] sm:$0xff] %v106_v17 }
  0x37   :  { %192 = shalt.err (!%p189_p0)
}
  0x38   :  { %120 = dma.vmem_to_hbm [thread:$0]  %s115_s1, 256, %s247_s2, [#allocation4], %s208_s12, %s208_s12, %s209_s13  }
  0x39   :  { %205 = dma.done.wait [#allocation4], 256  }
  0x3a   :  { %206 = vsyncadd [#allocation4], 4294967040 }
  0x3b   :  { %124 = vsyncpa [#allocation3], 1 }
  0x3c   :  { %125 = vsyncpa [#allocation6], 1 }
  0x3d   :  { %126 = vsyncpa [#allocation4], 1 }

</bundles_post_ra>
